<compile_context>
chip_gen: v7x
topology: tpu7x:2x2x1
jax: 0.10.0
libtpu: 0.0.40
codegen_flags: <defaults>
</compile_context>

<pallas_src>
import math

import jax
import jax.numpy as jnp
from jax.experimental import pallas as pl
from jax.experimental.pallas import tpu as pltpu

_LANE_ALIGN = 128

# v7x-safe defaults (64 MiB VMEM per TensorCore); upgraded at wrapper time when
# a 128 MiB part (v5e / v6e) is detected.
_BLOCK_BYTES_SMALL_VMEM = 8 << 20
_VMEM_LIMIT_SMALL_VMEM = 48 << 20
_BLOCK_BYTES_BIG_VMEM = 16 << 20
_VMEM_LIMIT_BIG_VMEM = 96 << 20

_MIN_SPLIT_BYTES = 1 << 20      # don't force multi-step grids on tiny tensors
_TARGET_GRID_STEPS = 4          # >= 2x TensorCore count (v7x megacore)


def _hw_budgets():
    """(max_block_bytes, vmem_limit_bytes), generation-aware with safe fallback."""
    block, vmem = _BLOCK_BYTES_SMALL_VMEM, _VMEM_LIMIT_SMALL_VMEM
    try:
        cap = getattr(pltpu.get_tpu_info(), "vmem_capacity_bytes", None)
        if cap is not None and cap >= (96 << 20):
            block, vmem = _BLOCK_BYTES_BIG_VMEM, _VMEM_LIMIT_BIG_VMEM
    except Exception:
        pass  # keep conservative (v7x-safe) defaults
    return block, vmem


def _scale_kernel(x_ref, s_ref, o_ref):
    # x_ref: (tile_R, tile_L) input tile (native dtype)
    # s_ref: (1, tile_L) scale tile in compute dtype (broadcast over rows)
    # o_ref: (tile_R, tile_L) output tile (requested / promoted dtype)
    o_ref[...] = (x_ref[...].astype(s_ref.dtype) * s_ref[...]).astype(o_ref.dtype)


def scale_forward(x, scale, *, out_dtype=None,
                  max_block_bytes=None, vmem_limit_bytes=None):
    """Return x * scale, where scale (shape (C,)) broadcasts over x's last axis.

    out_dtype=None keeps PyTorch promotion semantics (result_type(x, scale));
    pass e.g. jnp.bfloat16 to keep bf16 outputs and cut HBM traffic.
    """
    orig_shape = x.shape
    C = orig_shape[-1]
    assert scale.shape == (C,), "scale must broadcast against the last axis of x"

    hw_block, hw_vmem = _hw_budgets()
    if max_block_bytes is None:
        max_block_bytes = hw_block
    if vmem_limit_bytes is None:
        vmem_limit_bytes = hw_vmem

    compute_dtype = jnp.result_type(x.dtype, scale.dtype)
    if out_dtype is None:
        out_dtype = compute_dtype          # PyTorch promotion semantics
    in_it = jnp.dtype(x.dtype).itemsize
    out_it = jnp.dtype(out_dtype).itemsize
    pair_it = in_it + out_it

    rows = math.prod(orig_shape[:-1]) if len(orig_shape) > 1 else 1

    # Lane-dense fold: make the trailing (lane) dim a multiple of 128 when possible
    # by folding k rows into the lane axis. Pure layout plumbing, no extra compute.
    k = 1
    if C % _LANE_ALIGN != 0:
        k_needed = math.lcm(C, _LANE_ALIGN) // C
        if rows % k_needed == 0:
            k = k_needed
    R = rows // k
    L = k * C

    x2 = x.reshape(R, L)                                       # contiguous: free reshape
    s2 = jnp.tile(scale.astype(compute_dtype), k).reshape(1, L)

    # Dtype-specific minimum sublane height: 8 rows f32, 16 bf16, 32 int8/fp8.
    row_align = max(8, 32 // min(in_it, out_it))

    # Lane tile: prefer the full row (one contiguous DMA per block). Only split
    # the lane axis when even a min-height full-row block blows the budget and
    # the row is 128-aligned (otherwise full-dim is the only legal block width).
    if row_align * L * pair_it > max_block_bytes and L % _LANE_ALIGN == 0:
        tile_L = (max_block_bytes // (row_align * pair_it)) // _LANE_ALIGN * _LANE_ALIGN
        tile_L = min(L, max(_LANE_ALIGN, tile_L))
    else:
        tile_L = L

    # Row tile: as many rows as fit in the per-block byte budget (multiple of
    # row_align), or the full row extent when the array is small.
    max_rows = max(row_align,
                   (max_block_bytes // (tile_L * pair_it)) // row_align * row_align)
    tile_R = R if R <= max_rows else max_rows

    # Megacore / pipelining: make sure a non-trivial tensor yields >= ~4 grid
    # steps so both v7x TensorCores stream and prefetch overlaps compute.
    lane_blocks = pl.cdiv(L, tile_L)
    total_bytes = R * L * pair_it
    if (total_bytes > _MIN_SPLIT_BYTES
            and lane_blocks * pl.cdiv(R, tile_R) < _TARGET_GRID_STEPS
            and R >= _TARGET_GRID_STEPS * row_align):
        want_row_blocks = -(-_TARGET_GRID_STEPS // lane_blocks)
        tile_R_cap = max(row_align, (R // want_row_blocks) // row_align * row_align)
        tile_R = min(tile_R, tile_R_cap)

    # Grid order (lane_blocks, row_blocks): row axis innermost, so the scale
    # block index is constant across the inner loop (no per-step scale re-DMA).
    grid = (pl.cdiv(L, tile_L), pl.cdiv(R, tile_R))

    cost = pl.CostEstimate(
        flops=R * L,
        transcendentals=0,
        bytes_accessed=R * L * pair_it + L * jnp.dtype(compute_dtype).itemsize,
    )

    out = pl.pallas_call(
        _scale_kernel,
        out_shape=jax.ShapeDtypeStruct((R, L), out_dtype),
        grid_spec=pltpu.PrefetchScalarGridSpec(
            num_scalar_prefetch=0,
            grid=grid,
            in_specs=[
                pl.BlockSpec((tile_R, tile_L), lambda j, i: (i, j)),
                pl.BlockSpec((1, tile_L), lambda j, i: (0, j)),
            ],
            out_specs=pl.BlockSpec((tile_R, tile_L), lambda j, i: (i, j)),
        ),
        compiler_params=pltpu.CompilerParams(
            dimension_semantics=("parallel", "parallel"),
            vmem_limit_bytes=vmem_limit_bytes,
        ),
        cost_estimate=cost,
    )(x2, s2)

    return out.reshape(orig_shape)


if __name__ == "__main__":
    key = jax.random.PRNGKey(0)
    k1, k2 = jax.random.split(key)

    # Module config: Scale(dim=C, init_value=1.0); x is (B, N, C) channels-last.
    B, N, C = 2, 8, 32
    init_value = 1.0
    x = jax.random.normal(k1, (B, N, C), dtype=jnp.float32)

    # Deterministic parameter init exactly as in __init__ (then perturbed
    # deterministically so the multiply is non-trivial to verify).
    scale = init_value * jnp.ones((C,), dtype=jnp.float32)
    scale = scale * (1.0 + 0.1 * jnp.arange(C, dtype=jnp.float32) / C)

    # Main case: exercises the lane-dense fold (C=32 -> k=4 -> lane dim 128).
    y = scale_forward(x, scale)
    jax.block_until_ready(y)
    y_ref = x * scale
    assert y.shape == x.shape and y.dtype == x.dtype
    assert jnp.allclose(y, y_ref, atol=1e-6, rtol=1e-6)

    # Awkward shape: rows not divisible by the fold factor and C not a multiple
    # of 128 -> full-dim blocks + cdiv grid path (masked-store fallback).
    x_odd = jax.random.normal(k2, (3, 5, 48), dtype=jnp.float32)
    s_odd = jnp.ones((48,), dtype=jnp.float32) * (
        1.0 + jnp.arange(48, dtype=jnp.float32) / 96.0)
    y_odd = scale_forward(x_odd, s_odd)
    jax.block_until_ready(y_odd)
    assert jnp.allclose(y_odd, x_odd * s_odd, atol=1e-6, rtol=1e-6)

    # Mixed precision (default): bf16 activations * f32 learnable scale promotes
    # to f32, matching PyTorch's type-promotion semantics.
    x_bf16 = x.astype(jnp.bfloat16)
    y_mixed = scale_forward(x_bf16, scale)
    jax.block_until_ready(y_mixed)
    assert y_mixed.dtype == jnp.float32
    assert jnp.allclose(y_mixed, x_bf16.astype(jnp.float32) * scale,
                        atol=1e-6, rtol=1e-6)

    # Mixed precision with out_dtype knob: keep bf16 outputs (less HBM traffic).
    y_bf16 = scale_forward(x_bf16, scale, out_dtype=jnp.bfloat16)
    jax.block_until_ready(y_bf16)
    assert y_bf16.dtype == jnp.bfloat16
    ref_bf16 = (x_bf16.astype(jnp.float32) * scale).astype(jnp.bfloat16)
    assert jnp.allclose(y_bf16.astype(jnp.float32), ref_bf16.astype(jnp.float32),
                        atol=1e-2, rtol=1e-2)

    print("KERNEL_OK")
</pallas_src>

<mosaic_0001>
module attributes {stable_mosaic.version = 11 : i64} {
  func.func @_scale_kernel(%arg0: i32, %arg1: i32, %arg2: memref<4x128xf32, #tpu.memory_space<vmem>>, %arg3: memref<1x128xf32, #tpu.memory_space<vmem>>, %arg4: memref<4x128xf32, #tpu.memory_space<vmem>>) attributes {dimension_semantics = [#tpu.dimension_semantics<parallel>, #tpu.dimension_semantics<parallel>], iteration_bounds = array<i64: 1, 1>, scalar_prefetch = 0 : i64, scratch_operands = 0 : i64, tpu.core_type = #tpu.core_type<tc>, window_params = [{transform_indices = @transform_0, window_bounds = array<i64: 4, 128>}, {transform_indices = @transform_1, window_bounds = array<i64: 1, 128>}, {transform_indices = @transform_2, window_bounds = array<i64: 4, 128>}]} {
    %c0 = arith.constant 0 : index
    %c0_0 = arith.constant 0 : index
    %0 = vector.load %arg2[%c0, %c0_0] : memref<4x128xf32, #tpu.memory_space<vmem>>, vector<4x128xf32>
    %c0_1 = arith.constant 0 : index
    %c0_2 = arith.constant 0 : index
    %1 = vector.load %arg3[%c0_1, %c0_2] : memref<1x128xf32, #tpu.memory_space<vmem>>, vector<1x128xf32>
    %2 = vector.broadcast %1 : vector<1x128xf32> to vector<4x128xf32>
    %3 = arith.mulf %0, %2 : vector<4x128xf32>
    %c0_3 = arith.constant 0 : index
    %c0_4 = arith.constant 0 : index
    %4 = vector.load %arg4[%c0_3, %c0_4] : memref<4x128xf32, #tpu.memory_space<vmem>>, vector<4x128xf32>
    tpu.vector_store %arg4[%c0_3, %c0_4], %3 {strides = array<i32>} : memref<4x128xf32, #tpu.memory_space<vmem>>, vector<4x128xf32>,
    return
  }
  func.func @transform_0(%arg0: i32, %arg1: i32) -> (i32, i32) {
    %c0_i32 = arith.constant 0 : i32
    return %arg1, %arg0 : i32, i32
  }
  func.func @transform_1(%arg0: i32, %arg1: i32) -> (i32, i32) {
    %c0_i32 = arith.constant 0 : i32
    %c0_i32_0 = arith.constant 0 : i32
    return %c0_i32, %arg0 : i32, i32
  }
  func.func @transform_2(%arg0: i32, %arg1: i32) -> (i32, i32) {
    %c0_i32 = arith.constant 0 : i32
    return %arg1, %arg0 : i32, i32
  }
}

</mosaic_0001>

<bundles_post_ra>
// kernel: tpu_custom_call.1
= control target key start
LH: loop header
LB: loop body
LE: loop exit
PB: predicated region body
PF: predicated region fallthrough
CT: control target
= control target key end

     0   :  { %7 = vsyncpa [#allocation3], 0  ;;  %s144_s0 = inlined_call_operand.hbm [shape: f32[4,128], index: 0, kind: input, shape index: {}]   ;;  %s145_s1 = inlined_call_operand.vmem [shape: f32[1,128], index: 1, kind: input, shape index: {}]   ;;  %s146_s2 = inlined_call_operand.hbm [shape: f32[4,128], index: 2, kind: output, shape index: {}]  }
   0x1   :  { %8 = vsyncpa [#allocation4], 0  ;;  %s100_s9 = smov [#allocation2]   ;;  %s52_s13 = scalar_lea.hbm %s144_s0, 64 }
   0x2   :  { %s15_s10 = sshll.u32 %s100_s9, 4  ;;  %p53_p0 = scmp.ne.s32.totalorder %s144_s0, %s52_s13  ;;  %s16_s10 = int_to_ptr.vmem [resolvable:$true] %s15_s10 }
   0x3   :  { %p56_p1 = scmp.lt.u32.totalorder %s52_s13, %s144_s0 }
   0x5   :  { %p58_p2 = pnand %p56_p1, %p53_p0 }
   0x7   :  { %61 = shalt.err (!%p58_p2)
}
   0x8   :  { %s62_s18 = scalar_lea.vmem %s16_s10, 64  ;;  %p67_p4 = scmp.lt.s32.totalorder %s16_s10, %s16_s10 }
   0x9   :  { %p63_p3 = scmp.ne.s32.totalorder %s16_s10, %s62_s18  ;;  %p68_p5 = scmp.lt.s32.totalorder %s62_s18, %s62_s18 }
   0xb   :  { %p69_p6 = por %p68_p5, %p67_p4 }
   0xd   :  { %p70_p7 = pnand %p69_p6, %p63_p3 }
   0xf   :  { %73 = shalt.err (!%p70_p7)
}
  0x10   :  { %18 = dma.hbm_to_vmem [thread:$0]  %s144_s0, 64, %s16_s10, [#allocation3]  }
  0x11   :  { %96 = dma.done.wait [#allocation3], 64  }
  0x12   :  { %97 = vsyncadd [#allocation3], 4294967232  ;;  %s101_s21 = smov [#allocation5]   ;;  %v24_v0 = vld [vmem:[#allocation2] sm:$0xf] }
  0x13   :  { %s40_s22 = sshll.u32 %s101_s21, 4  ;;  %v49_v1 = vld [vmem:[%s145_s1] ss:$0 sm:$0xff]  ;;  %s41_s22 = int_to_ptr.vmem [resolvable:$true] %s40_s22 }
  0x14   :  { %v32_v2 = vmul.f32 %v49_v1, %v24_v0  ;;  %s74_s25 = scalar_lea.vmem %s41_s22, 64  ;;  %p79_p9 = scmp.lt.s32.totalorder %s41_s22, %s41_s22 }
  0x15   :  { %p75_p8 = scmp.ne.s32.totalorder %s41_s22, %s74_s25  ;;  %p80_p10 = scmp.lt.s32.totalorder %s74_s25, %s74_s25 }
  0x16   :  { %33 = vst [vmem:[#allocation5] sm:$0xf] %v32_v2 }
  0x17   :  { %p81_p11 = por %p80_p10, %p79_p9 }
  0x19   :  { %p82_p12 = pnand %p81_p11, %p75_p8 }
  0x1b   :  { %85 = shalt.err (!%p82_p12)
}
  0x1c   :  { %s86_s27 = scalar_lea.hbm %s146_s2, 64 }
  0x1d   :  { %p87_p13 = scmp.ne.s32.totalorder %s146_s2, %s86_s27  ;;  %p90_p0 = scmp.lt.u32.totalorder %s86_s27, %s146_s2 }
  0x1f   :  { %p92_p1 = pnand %p90_p0, %p87_p13 }
  0x21   :  { %95 = shalt.err (!%p92_p1)
}
  0x22   :  { %43 = dma.vmem_to_hbm [thread:$0]  %s41_s22, 64, %s146_s2, [#allocation4]  }
  0x23   :  { %98 = dma.done.wait [#allocation4], 64  }
  0x24   :  { %99 = vsyncadd [#allocation4], 4294967232 }
  0x25   :  { %47 = vsyncpa [#allocation3], 1 }
  0x26   :  { %48 = vsyncpa [#allocation4], 1 }

</bundles_post_ra>
